<compile_context>
chip_gen: v7x
topology: tpu7x:2x2x1
jax: 0.10.0
libtpu: 0.0.40
codegen_flags: <defaults>
</compile_context>

<pallas_src>
import jax
import jax.numpy as jnp
from jax.experimental import pallas as pl
from jax.experimental.pallas import tpu as pltpu

SIGNAL_DIM = 32
FR_SIZE = 128
BATCH = 4


def _periodogram_kernel(x_ref, e_ref, out_ref):
    # x_ref: (B, 2S) = [xr | xi];  e_ref: (2S, 2F) block dictionary;  out_ref: (B, F)
    F = out_ref.shape[-1]
    S = x_ref.shape[-1] // 2

    # One fused complex matmul on the MXU (replaces 4 real matmuls).
    z = jnp.dot(x_ref[...], e_ref[...], preferred_element_type=jnp.float32)  # (B, 2F)
    zr = z[:, :F]
    zi = z[:, F:]

    # Periodogram: squared magnitude (no sqrt needed), scaled by 1/S.
    est = (zr * zr + zi * zi) * jnp.float32(1.0 / S)

    # Per-sample normalization (matches torch max(dim=1, keepdim=True)).
    row_max = jnp.max(est, axis=-1, keepdims=True)
    out_ref[...] = est / row_max


def periodogram_pallas(x, xgrid):
    """x: (B, 2, S) float32 (real/imag channels), xgrid: (F,) float32 -> (B, F) float32."""
    B, _, S = x.shape
    F = xgrid.shape[0]

    # Fourier dictionary exp(-2j*pi*xgrid[f]*t), split into real/imag planes and
    # pre-assembled into the (2S, 2F) real block form of the complex matmul.
    t = jnp.arange(S, dtype=jnp.float32)
    phase = 2.0 * jnp.pi * t[:, None] * xgrid[None, :]           # (S, F)
    er = jnp.cos(phase)
    ei = -jnp.sin(phase)                                         # exp(-j*phase) = er + j*ei
    e_blk = jnp.concatenate(
        [jnp.concatenate([er, ei], axis=1),
         jnp.concatenate([-ei, er], axis=1)], axis=0)            # (2S, 2F)

    # Pack real/imag along the contraction axis: (B, 2S).
    x_blk = jnp.concatenate([x[:, 0, :], x[:, 1, :]], axis=-1)

    return pl.pallas_call(
        _periodogram_kernel,
        out_shape=jax.ShapeDtypeStruct((B, F), jnp.float32),
        in_specs=[
            pl.BlockSpec(memory_space=pltpu.MemorySpace.VMEM),   # x_blk
            pl.BlockSpec(memory_space=pltpu.MemorySpace.VMEM),   # e_blk
        ],
        out_specs=pl.BlockSpec(memory_space=pltpu.MemorySpace.VMEM),
    )(x_blk, e_blk)


if __name__ == "__main__":
    # xgrid parameter: uniform frequency grid on [-0.5, 0.5)
    xgrid = -0.5 + jnp.arange(FR_SIZE, dtype=jnp.float32) / FR_SIZE

    key = jax.random.PRNGKey(0)
    x = jax.random.normal(key, (BATCH, 2, SIGNAL_DIM), dtype=jnp.float32)

    y = jax.block_until_ready(periodogram_pallas(x, xgrid))
    assert y.shape == (BATCH, FR_SIZE)
    assert bool(jnp.all(jnp.isfinite(y)))

    # Pure-JAX reference (same math, all real f32) for a correctness check.
    tt = jnp.arange(SIGNAL_DIM, dtype=jnp.float32)
    ph = 2.0 * jnp.pi * tt[:, None] * xgrid[None, :]
    cr, ci = jnp.cos(ph), -jnp.sin(ph)
    xr, xi = x[:, 0, :], x[:, 1, :]
    zr = xr @ cr - xi @ ci
    zi = xr @ ci + xi @ cr
    est = (zr * zr + zi * zi) / SIGNAL_DIM
    ref = est / jnp.max(est, axis=-1, keepdims=True)
    assert bool(jnp.allclose(y, ref, rtol=2e-3, atol=2e-3))

    print("KERNEL_OK")
</pallas_src>

<mosaic_0001>
module attributes {stable_mosaic.version = 11 : i64} {
  func.func @_periodogram_kernel(%arg0: memref<4x64xf32, #tpu.memory_space<vmem>>, %arg1: memref<64x256xf32, #tpu.memory_space<vmem>>, %arg2: memref<4x128xf32, #tpu.memory_space<vmem>>) attributes {dimension_semantics = [], scalar_prefetch = 0 : i64, scratch_operands = 0 : i64, tpu.core_type = #tpu.core_type<tc>} {
    %c0 = arith.constant 0 : index
    %c0_0 = arith.constant 0 : index
    %0 = vector.load %arg0[%c0, %c0_0] : memref<4x64xf32, #tpu.memory_space<vmem>>, vector<4x64xf32>
    %c0_1 = arith.constant 0 : index
    %c0_2 = arith.constant 0 : index
    %1 = vector.load %arg1[%c0_1, %c0_2] : memref<64x256xf32, #tpu.memory_space<vmem>>, vector<64x256xf32>
    %cst = arith.constant dense<0.000000e+00> : vector<4x256xf32>
    %2 = tpu.matmul %0, %1, %cst {dimension_numbers = #tpu.dot_dimension_numbers<[1], [0], [0], [1], [0, 0, 1, 1], [], []>} : vector<4x64xf32>, vector<64x256xf32>, vector<4x256xf32> -> vector<4x256xf32>
    %3 = vector.extract_strided_slice %2 {offsets = [0, 0], sizes = [4, 128], strides = [1, 1]} : vector<4x256xf32> to vector<4x128xf32>
    %4 = vector.extract_strided_slice %2 {offsets = [0, 128], sizes = [4, 128], strides = [1, 1]} : vector<4x256xf32> to vector<4x128xf32>
    %5 = arith.mulf %3, %3 : vector<4x128xf32>
    %6 = arith.mulf %4, %4 : vector<4x128xf32>
    %7 = arith.addf %5, %6 : vector<4x128xf32>
    %cst_3 = arith.constant 3.125000e-02 : f32
    %8 = vector.broadcast %cst_3 : f32 to vector<4x128xf32>
    %9 = arith.mulf %7, %8 : vector<4x128xf32>
    %cst_4 = arith.constant dense<0xFF800000> : vector<4xf32>
    %10 = vector.multi_reduction <maximumf>, %9, %cst_4 [1] : vector<4x128xf32> to vector<4xf32>
    %11 = vector.shape_cast %10 : vector<4xf32> to vector<4x1xf32>
    %12 = vector.broadcast %11 : vector<4x1xf32> to vector<4x128xf32>
    %13 = arith.divf %9, %12 : vector<4x128xf32>
    %c0_5 = arith.constant 0 : index
    %c0_6 = arith.constant 0 : index
    %14 = vector.load %arg2[%c0_5, %c0_6] : memref<4x128xf32, #tpu.memory_space<vmem>>, vector<4x128xf32>
    tpu.vector_store %arg2[%c0_5, %c0_6], %13 {strides = array<i32>} : memref<4x128xf32, #tpu.memory_space<vmem>>, vector<4x128xf32>,
    return
  }
}

</mosaic_0001>

<bundles_post_ra>
// kernel: tpu_custom_call.1
= control target key start
LH: loop header
LB: loop body
LE: loop exit
PB: predicated region body
PF: predicated region fallthrough
CT: control target
= control target key end

     0   :  { %7 = vsyncpa [#allocation3], 0  ;;  %s318_s0 = inlined_call_operand.hbm [shape: f32[4,64], index: 0, kind: input, shape index: {}]   ;;  %s319_s1 = inlined_call_operand.hbm [shape: f32[64,256], index: 1, kind: input, shape index: {}]   ;;  %s320_s2 = inlined_call_operand.hbm [shape: f32[4,128], index: 2, kind: output, shape index: {}]  }
   0x1   :  { %8 = vsyncpa [#allocation6], 0 }
   0x2   :  { %9 = vsyncpa [#allocation4], 0  ;;  %s254_s9 = smov [#allocation2]   ;;  %s255_s11 = smov [#allocation5]  }
   0x3   :  { %s16_s10 = sshll.u32 %s254_s9, 4  ;;  %s25_s12 = sshll.u32 %s255_s11, 4  ;;  %s17_s10 = int_to_ptr.vmem [resolvable:$true] %s16_s10  ;;  %s275_s12 = int_to_ptr.vmem [resolvable:$true] %s25_s12 }
   0x4   :  { %s182_s15 = scalar_lea.hbm %s318_s0, 64 }
   0x5   :  { %p183_p0 = scmp.ne.s32.totalorder %s318_s0, %s182_s15  ;;  %p186_p1 = scmp.lt.u32.totalorder %s182_s15, %s318_s0 }
   0x7   :  { %p188_p2 = pnand %p186_p1, %p183_p0 }
   0x9   :  { %191 = shalt.err (!%p188_p2)
}
   0xa   :  { %s192_s20 = scalar_lea.vmem %s17_s10, 64  ;;  %p197_p4 = scmp.lt.s32.totalorder %s17_s10, %s17_s10 }
   0xb   :  { %p193_p3 = scmp.ne.s32.totalorder %s17_s10, %s192_s20  ;;  %p198_p5 = scmp.lt.s32.totalorder %s192_s20, %s192_s20 }
   0xd   :  { %p199_p6 = por %p198_p5, %p197_p4 }
   0xf   :  { %p200_p7 = pnand %p199_p6, %p193_p3 }
  0x11   :  { %203 = shalt.err (!%p200_p7)
}
  0x12   :  { %19 = dma.hbm_to_vmem [thread:$0]  %s318_s0, 64, %s17_s10, [#allocation3]  }
  0x13   :  { %s204_s25 = scalar_lea.hbm %s319_s1, 2048 }
  0x14   :  { %p205_p8 = scmp.ne.s32.totalorder %s319_s1, %s204_s25  ;;  %p208_p9 = scmp.lt.u32.totalorder %s204_s25, %s319_s1 }
  0x16   :  { %p210_p10 = pnand %p208_p9, %p205_p8 }
  0x18   :  { %213 = shalt.err (!%p210_p10)
}
  0x19   :  { %s214_s30 = scalar_lea.vmem %s275_s12, 2048  ;;  %p219_p12 = scmp.lt.s32.totalorder %s275_s12, %s275_s12 }
  0x1a   :  { %p215_p11 = scmp.ne.s32.totalorder %s275_s12, %s214_s30  ;;  %p220_p13 = scmp.lt.s32.totalorder %s214_s30, %s214_s30 }
  0x1c   :  { %p221_p0 = por %p220_p13, %p219_p12 }
  0x1e   :  { %p222_p1 = pnand %p221_p0, %p215_p11 }
  0x20   :  { %225 = shalt.err (!%p222_p1)
}
  0x21   :  { %s256_s0 = smov 256   ;;  %s257_s3 = smov 16  }
  0x22   :  { %31 = dma.hbm_to_vmem [thread:$0]  %s319_s1, 2048, %s275_s12, [#allocation6], %s256_s0, %s256_s0, %s257_s3  }
  0x23   :  { %248 = dma.done.wait [#allocation3], 64  }
  0x24   :  { %249 = vsyncadd [#allocation3], 4294967232 }
  0x25   :  { %250 = dma.done.wait [#allocation6], 2048  }
  0x26   :  { %251 = vsyncadd [#allocation6], 4294965248  ;;  %v258_v0 = vmov 0.0   ;;  %v40_v1 = vld [vmem:[#allocation5 + $0x8] sm:$0xff]  ;;  %v42_v2 = vld [vmem:[#allocation5 + $0x18] sm:$0xff]  ;;  %vm55_vm0 = vcmask 523264  }
  0x27   :  { %123 = vmatprep.mubr.f32.mxu0 %v258_v0  ;;  %v39_v3 = vld [vmem:[#allocation5] sm:$0xff]  ;;  %v158_v4 = vpack.c.bf16 %v42_v2, %v40_v1  ;;  %v41_v5 = vld [vmem:[#allocation5 + $0x10] sm:$0xff]  ;;  %v44_v6 = vld [vmem:[#allocation5 + $0x28] sm:$0xff]  ;;  %vm134_vm1 = vcmask 1043456   ;;  %s259_s1 = smov [#allocation7]  }
  0x28   :  { %v46_v7 = vld [vmem:[#allocation5 + $0x38] sm:$0xff]  ;;  %v160_v8 = vpack.c.bf16 %v41_v5, %v39_v3  ;;  %v43_v10 = vld [vmem:[#allocation5 + $0x20] sm:$0xff]  ;;  %v45_v11 = vld [vmem:[#allocation5 + $0x30] sm:$0xff]  ;;  %s147_s6 = sshll.u32 %s259_s1, 4  ;;  %s148_s6 = int_to_ptr.vmem [resolvable:$true] %s147_s6 }
  0x29   :  { %v162_v9 = vpack.c.bf16 %v46_v7, %v44_v6  ;;  %v48_v12 = vld [vmem:[#allocation5 + $0x48] sm:$0xff]  ;;  %159 = vmatprep.subr.bf16.mxu0 %v158_v4  ;;  %v50_v13 = vld [vmem:[#allocation5 + $0x58] sm:$0xff]  ;;  %v164_v14 = vpack.c.bf16 %v45_v11, %v43_v10  ;;  %v47_v16 = vld [vmem:[#allocation5 + $0x40] sm:$0xff]  ;;  %s226_s7 = scalar_lea.vmem %s148_s6, 64  ;;  %p231_p3 = scmp.lt.s32.totalorder %s148_s6, %s148_s6 }
  0x2a   :  { %161 = vmatpush1.bf16.msra.mxu0 %v160_v8  ;;  %v166_v15 = vpack.c.bf16 %v50_v13, %v48_v12  ;;  %v49_v17 = vld [vmem:[#allocation5 + $0x50] sm:$0xff]  ;;  %v52_v18 = vld [vmem:[#allocation5 + $0x68] sm:$0xff]  ;;  %v54_v19 = vld [vmem:[#allocation5 + $0x78] sm:$0xff]  ;;  %p227_p2 = scmp.ne.s32.totalorder %s148_s6, %s226_s7  ;;  %p232_p4 = scmp.lt.s32.totalorder %s226_s7, %s226_s7 }
  0x2b   :  { %163 = vmatprep.subr.bf16.mxu0 %v162_v9  ;;  %v168_v20 = vpack.c.bf16 %v49_v17, %v47_v16  ;;  %v170_v21 = vpack.c.bf16 %v54_v19, %v52_v18  ;;  %v51_v22 = vld [vmem:[#allocation5 + $0x60] sm:$0xff]  ;;  %v53_v23 = vld [vmem:[#allocation5 + $0x70] sm:$0xff]  ;;  %v38_v25 = vld [vmem:[#allocation2] sm:$0xf] }
  0x2c   :  { %v172_v24 = vpack.c.bf16 %v53_v23, %v51_v22  ;;  %p233_p5 = por %p232_p4, %p231_p3 }
  0x2e   :  { %165 = vmatpush1.bf16.msra.mxu0 %v164_v14  ;;  %p234_p6 = pnand %p233_p5, %p227_p2 }
  0x2f   :  { %167 = vmatprep.subr.bf16.mxu0 %v166_v15 }
  0x32   :  { %169 = vmatpush1.bf16.msra.mxu0 %v168_v20 }
  0x33   :  { %171 = vmatprep.subr.bf16.mxu0 %v170_v21 }
  0x36   :  { %173 = vmatpush1.bf16.msra.mxu0 %v172_v24 }
  0x39   :  { %157 = vmatmul.mubr.msk.f32.vlgmr.msra.gmra.mrb[0].mxu0 %vm55_vm0, %v38_v25 }
 0x10c   :  { %v125_v26 = vpop.f32.mrb[0].mxu0 }
 0x10d   :  { %v130_v27 = vmul.f32 %v125_v26, %v125_v26  ;;  %v127_v28 = vpop.f32.mrb[1].mxu0 }
 0x10e   :  { %v131_v29 = vmul.f32 %v127_v28, %v127_v28 }
 0x110   :  { %v132_v30 = vadd.f32 %v131_v29, %v130_v27 }
 0x112   :  { %v133_v31 = vmul.f32 0.03125, %v132_v30 }
 0x114   :  { %v135_v32 = vsel %vm134_vm1, %v133_v31, -inf }
 0x115   :  { %136 = vmax.xlane.f32.xlu0 %v135_v32 }
 0x1a2   :  { %v137_v33 = vpop.xlane.xlu0 %136 }
 0x1a3   :  { %180 = vrcp.f32 %v137_v33 }
 0x1ad   :  { %v181_v34 = vpop.eup %180 }
 0x1ae   :  { %v139_v35 = vmul.f32 %v181_v34, %v133_v31 }
 0x1b0   :  { %140 = vst [vmem:[#allocation7] sm:$0xf] %v139_v35 }
 0x1b1   :  { %237 = shalt.err (!%p234_p6)
}
 0x1b2   :  { %s238_s10 = scalar_lea.hbm %s320_s2, 64 }
 0x1b3   :  { %p239_p7 = scmp.ne.s32.totalorder %s320_s2, %s238_s10  ;;  %p242_p8 = scmp.lt.u32.totalorder %s238_s10, %s320_s2 }
 0x1b5   :  { %p244_p9 = pnand %p242_p8, %p239_p7 }
 0x1b7   :  { %247 = shalt.err (!%p244_p9)
}
 0x1b8   :  { %150 = dma.vmem_to_hbm [thread:$0]  %s148_s6, 64, %s320_s2, [#allocation4]  }
 0x1b9   :  { %252 = dma.done.wait [#allocation4], 64  }
 0x1ba   :  { %253 = vsyncadd [#allocation4], 4294967232 }
 0x1bb   :  { %154 = vsyncpa [#allocation3], 1 }
 0x1bc   :  { %155 = vsyncpa [#allocation6], 1 }
 0x1bd   :  { %156 = vsyncpa [#allocation4], 1 }

</bundles_post_ra>
